<compile_context>
chip_gen: v6e
topology: v6e:2x2x1
jax: 0.10.0
libtpu: 0.0.40
codegen_flags: <defaults>
</compile_context>

<pallas_src>
import functools

import jax
import jax.numpy as jnp
from jax.experimental import pallas as pl
from jax.experimental.pallas import tpu as pltpu


# ----------------------------------------------------------------------------
# Kernel 1: row-tiled dense projection  XW = X @ W   (bf16 in, bf16 out,
# f32 accumulation).  W is small (<=128x128 here) and stays resident.
# ----------------------------------------------------------------------------
def _proj_kernel(x_ref, w_ref, out_ref):
    out_ref[...] = jnp.dot(
        x_ref[...], w_ref[...], preferred_element_type=jnp.float32
    ).astype(out_ref.dtype)


# ----------------------------------------------------------------------------
# Kernel 2 (layer 1): acc += A[i,k] @ XW1[k*TK:(k+1)*TK]; at last k apply
# bias + PReLU (f32) and immediately project with W2 (f32, hoisted H1 @ W2),
# emitting bf16 for layer 2.  XW1 is a VMEM-resident full-array block.
# ----------------------------------------------------------------------------
def _agg_proj_kernel(alpha_ref, a_ref, xw_ref, b_ref, w2_ref, out_ref, acc_ref):
    k = pl.program_id(1)
    tk = a_ref.shape[1]

    @pl.when(k == 0)
    def _():
        acc_ref[...] = jnp.zeros_like(acc_ref)

    start = pl.multiple_of(k * tk, tk)
    xw_k = xw_ref[pl.ds(start, tk), :]                 # slice of resident XW1
    acc_ref[...] += jnp.dot(
        a_ref[...], xw_k, preferred_element_type=jnp.float32
    )

    @pl.when(k == pl.num_programs(1) - 1)
    def _():
        alpha = alpha_ref[0, 0]
        h = acc_ref[...] + b_ref[...]
        h = jnp.where(h >= 0, h, alpha * h)            # PReLU (f32)
        # Small (TM x 128) @ (128 x 128) projection kept fully in f32.
        out_ref[...] = jnp.dot(
            h, w2_ref[...], preferred_element_type=jnp.float32
        ).astype(out_ref.dtype)


# ----------------------------------------------------------------------------
# Kernel 3 (layer 2): acc += A[i,k] @ H1W2[k*TK:(k+1)*TK]; at last k add bias
# + PReLU and store the (lane-padded) final output in f32.  H1W2 is a
# VMEM-resident full-array block.
# ----------------------------------------------------------------------------
def _agg_final_kernel(alpha_ref, a_ref, hw_ref, b_ref, out_ref, acc_ref):
    k = pl.program_id(1)
    tk = a_ref.shape[1]

    @pl.when(k == 0)
    def _():
        acc_ref[...] = jnp.zeros_like(acc_ref)

    start = pl.multiple_of(k * tk, tk)
    hw_k = hw_ref[pl.ds(start, tk), :]
    acc_ref[...] += jnp.dot(
        a_ref[...], hw_k, preferred_element_type=jnp.float32
    )

    @pl.when(k == pl.num_programs(1) - 1)
    def _():
        alpha = alpha_ref[0, 0]
        h = acc_ref[...] + b_ref[...]
        out_ref[...] = jnp.where(h >= 0, h, alpha * h).astype(out_ref.dtype)


# ----------------------------------------------------------------------------
# Wrapper helpers
# ----------------------------------------------------------------------------
def _round_up(x, m):
    return (x + m - 1) // m * m


def _pad2(x, rows, cols):
    return jnp.pad(x, ((0, rows - x.shape[0]), (0, cols - x.shape[1])))


def _divisor_tile(n, target, granule):
    """Largest multiple of `granule` that divides `n` and is <= max(target, granule)."""
    target = max(int(target), granule)
    best = granule
    d = granule
    while d <= min(target, n):
        if n % d == 0:
            best = d
        d += granule
    return best


def _vmem_limit(bytes_needed):
    """Per-generation VMEM budget: requested bytes + margin, capped at 75% of physical."""
    cap = 64 * 1024 * 1024
    try:
        cap = int(pltpu.get_tpu_info().vmem_capacity_bytes)
    except Exception:
        pass
    want = int(bytes_needed * 1.5) + (8 << 20)
    return int(max(32 << 20, min(want, int(cap * 0.75))))


# ----------------------------------------------------------------------------
# Fused 2-layer GCN forward
# ----------------------------------------------------------------------------
@functools.partial(jax.jit, static_argnames=("tm", "tk"))
def ppmi_gcn_forward(a_hat, x, w1, b1, w2, b2, alpha, *, tm=512, tk=2048):
    """a_hat: [N,N] normalized adjacency (dense f32); x: [N,Din];
    w1: [Din,128], b1: [1,128]; w2: [128,16], b2: [1,16]; alpha: [1,1]."""
    n, din = x.shape
    h1f = w1.shape[1]
    h2f = w2.shape[1]

    # --- lane / tile friendly padding (no quadratic blow-up) ----------------
    n_pad = _round_up(n, 128)
    din_pad = _round_up(din, 128)
    h1_pad = _round_up(h1f, 128)              # 128
    h2_pad = _round_up(h2f, 128)              # 16 -> 128 (lane-dense stores)

    # Row tile: multiple of 8 dividing n_pad, capped at n_pad//2 so the
    # "parallel" row axis has >= 2 steps (keeps both v7x TensorCores busy).
    tm_eff = _divisor_tile(n_pad, min(tm, n_pad // 2), 8)
    # Contraction tile: multiple of 128 dividing n_pad -> contiguous bursts.
    tk_eff = _divisor_tile(n_pad, tk, 128)
    gm = n_pad // tm_eff
    gk = n_pad // tk_eff

    a_p = _pad2(a_hat, n_pad, n_pad).astype(jnp.bfloat16)
    x_p = _pad2(x, n_pad, din_pad).astype(jnp.bfloat16)
    w1_p = _pad2(w1, din_pad, h1_pad).astype(jnp.bfloat16)
    b1_p = _pad2(b1, 1, h1_pad).astype(jnp.float32)
    w2_p = _pad2(w2, h1_pad, h2_pad).astype(jnp.float32)   # small, kept f32
    b2_p = _pad2(b2, 1, h2_pad).astype(jnp.float32)
    alpha = alpha.reshape(1, 1).astype(jnp.float32)

    smem = pl.BlockSpec(memory_space=pltpu.MemorySpace.SMEM)

    # ---- pass 0: XW1 = X @ W1 (hoisted out of the A loop) ------------------
    xw1 = pl.pallas_call(
        _proj_kernel,
        out_shape=jax.ShapeDtypeStruct((n_pad, h1_pad), jnp.bfloat16),
        grid=(gm,),
        in_specs=[
            pl.BlockSpec((tm_eff, din_pad), lambda i: (i, 0)),
            pl.BlockSpec((din_pad, h1_pad), lambda i: (0, 0)),
        ],
        out_specs=pl.BlockSpec((tm_eff, h1_pad), lambda i: (i, 0)),
        compiler_params=pltpu.CompilerParams(
            dimension_semantics=("parallel",)),
        cost_estimate=pl.CostEstimate(
            flops=2 * n_pad * din_pad * h1_pad,
            transcendentals=0,
            bytes_accessed=n_pad * din_pad * 2 + n_pad * h1_pad * 2),
    )(x_p, w1_p)

    # ---- pass 1: H1W2 = PReLU(A @ XW1 + b1) @ W2 ---------------------------
    vmem1 = (2 * tm_eff * tk_eff * 2            # A tile (double buffered)
             + 2 * n_pad * h1_pad * 2           # resident XW1
             + 2 * h1_pad * h2_pad * 4          # W2 (f32)
             + 2 * tm_eff * h2_pad * 2          # output tile
             + tm_eff * h1_pad * 4              # f32 accumulator
             + 2 * h1_pad * 4)                  # bias
    h1w2 = pl.pallas_call(
        _agg_proj_kernel,
        out_shape=jax.ShapeDtypeStruct((n_pad, h2_pad), jnp.bfloat16),
        grid=(gm, gk),
        in_specs=[
            smem,                                                    # alpha
            pl.BlockSpec((tm_eff, tk_eff), lambda i, k: (i, k)),     # A tile
            pl.BlockSpec((n_pad, h1_pad), lambda i, k: (0, 0)),      # XW1 (resident)
            pl.BlockSpec((1, h1_pad), lambda i, k: (0, 0)),          # b1
            pl.BlockSpec((h1_pad, h2_pad), lambda i, k: (0, 0)),     # W2
        ],
        out_specs=pl.BlockSpec((tm_eff, h2_pad), lambda i, k: (i, 0)),
        scratch_shapes=[pltpu.VMEM((tm_eff, h1_pad), jnp.float32)],
        compiler_params=pltpu.CompilerParams(
            dimension_semantics=("parallel", "arbitrary"),
            vmem_limit_bytes=_vmem_limit(vmem1)),
        cost_estimate=pl.CostEstimate(
            flops=2 * n_pad * n_pad * h1_pad + 2 * n_pad * h1_pad * h2_pad,
            transcendentals=0,
            bytes_accessed=(n_pad * n_pad * 2 + n_pad * h1_pad * 2
                            + n_pad * h2_pad * 2)),
    )(alpha, a_p, xw1, b1_p, w2_p)

    # ---- pass 2: OUT = PReLU(A @ H1W2 + b2) --------------------------------
    vmem2 = (2 * tm_eff * tk_eff * 2            # A tile (double buffered)
             + 2 * n_pad * h2_pad * 2           # resident H1W2
             + 2 * tm_eff * h2_pad * 4          # output tile (f32)
             + tm_eff * h2_pad * 4              # f32 accumulator
             + 2 * h2_pad * 4)                  # bias
    out_pad = pl.pallas_call(
        _agg_final_kernel,
        out_shape=jax.ShapeDtypeStruct((n_pad, h2_pad), jnp.float32),
        grid=(gm, gk),
        in_specs=[
            smem,                                                    # alpha
            pl.BlockSpec((tm_eff, tk_eff), lambda i, k: (i, k)),     # A tile
            pl.BlockSpec((n_pad, h2_pad), lambda i, k: (0, 0)),      # H1W2 (resident)
            pl.BlockSpec((1, h2_pad), lambda i, k: (0, 0)),          # b2
        ],
        out_specs=pl.BlockSpec((tm_eff, h2_pad), lambda i, k: (i, 0)),
        scratch_shapes=[pltpu.VMEM((tm_eff, h2_pad), jnp.float32)],
        compiler_params=pltpu.CompilerParams(
            dimension_semantics=("parallel", "arbitrary"),
            vmem_limit_bytes=_vmem_limit(vmem2)),
        cost_estimate=pl.CostEstimate(
            flops=2 * n_pad * n_pad * h2_pad,
            transcendentals=0,
            bytes_accessed=(n_pad * n_pad * 2 + n_pad * h2_pad * 2
                            + n_pad * h2_pad * 4)),
    )(alpha, a_p, h1w2, b2_p)

    return out_pad[:n, :h2f]


# ----------------------------------------------------------------------------
# Glue: GCNConv normalization (self-loops, symmetric D^-1/2 (A+I) D^-1/2).
# ----------------------------------------------------------------------------
def build_normalized_adjacency(edge_index, edge_weight, num_nodes):
    src = edge_index[0]
    dst = edge_index[1]
    loop = jnp.arange(num_nodes, dtype=src.dtype)
    src = jnp.concatenate([src, loop])
    dst = jnp.concatenate([dst, loop])
    w = jnp.concatenate(
        [edge_weight.astype(jnp.float32),
         jnp.ones((num_nodes,), dtype=jnp.float32)])

    deg = jnp.zeros((num_nodes,), jnp.float32).at[dst].add(w)
    deg_inv_sqrt = jnp.where(deg > 0.0, jax.lax.rsqrt(deg), 0.0)
    norm = deg_inv_sqrt[src] * w * deg_inv_sqrt[dst]

    # A_hat[t, s]: normalized weight of edge s -> t (source_to_target flow).
    a_hat = jnp.zeros((num_nodes, num_nodes), jnp.float32).at[dst, src].add(norm)
    return a_hat


# ----------------------------------------------------------------------------
# Deterministic parameter construction (shapes from the module __init__).
# ----------------------------------------------------------------------------
def init_params(key, input_dim, h1=128, h2=16):
    k1, k2 = jax.random.split(key)
    w1 = jax.random.normal(k1, (input_dim, h1), jnp.float32) * (1.0 / jnp.sqrt(input_dim))
    b1 = jnp.zeros((1, h1), jnp.float32)
    w2 = jax.random.normal(k2, (h1, h2), jnp.float32) * (1.0 / jnp.sqrt(h1))
    b2 = jnp.zeros((1, h2), jnp.float32)
    alpha = jnp.full((1, 1), 0.25, jnp.float32)   # nn.PReLU() default init
    return w1, b1, w2, b2, alpha


# ----------------------------------------------------------------------------
# Pure-JAX (f32) reference.
# ----------------------------------------------------------------------------
def reference_forward(a_hat, x, w1, b1, w2, b2, alpha):
    al = alpha[0, 0]
    h1 = a_hat @ (x @ w1) + b1
    h1 = jnp.where(h1 >= 0, h1, al * h1)
    h2 = a_hat @ (h1 @ w2) + b2
    return jnp.where(h2 >= 0, h2, al * h2)


if __name__ == "__main__":
    key = jax.random.PRNGKey(0)
    k_x, k_ei, k_ew, k_p = jax.random.split(key, 4)

    num_nodes = 64
    input_dim = 32
    num_edges = 128

    x = jax.random.normal(k_x, (num_nodes, input_dim), jnp.float32)
    edge_index = jax.random.randint(k_ei, (2, num_edges), 0, num_nodes,
                                    dtype=jnp.int32)
    edge_attr = jax.random.uniform(k_ew, (num_edges,), jnp.float32,
                                   minval=0.1, maxval=1.0)

    w1, b1, w2, b2, alpha = init_params(k_p, input_dim)
    a_hat = build_normalized_adjacency(edge_index, edge_attr, num_nodes)

    out = ppmi_gcn_forward(a_hat, x, w1, b1, w2, b2, alpha)
    out = jax.block_until_ready(out)

    ref = reference_forward(a_hat, x, w1, b1, w2, b2, alpha)
    assert out.shape == (num_nodes, 16)
    # bf16 A / feature matmul operands with f32 accumulation (deliberate):
    # loosened tolerance vs the all-f32 reference.
    assert jnp.allclose(out, ref, atol=5e-2, rtol=5e-2)

    print("KERNEL_OK")
</pallas_src>

<mosaic_0001>
module attributes {stable_mosaic.version = 11 : i64} {
  func.func @_proj_kernel(%arg0: i32, %arg1: memref<64x128xbf16, #tpu.memory_space<vmem>>, %arg2: memref<128x128xbf16, #tpu.memory_space<vmem>>, %arg3: memref<64x128xbf16, #tpu.memory_space<vmem>>) attributes {dimension_semantics = [#tpu.dimension_semantics<parallel>], iteration_bounds = array<i64: 2>, scalar_prefetch = 0 : i64, scratch_operands = 0 : i64, tpu.core_type = #tpu.core_type<tc>, window_params = [{transform_indices = @transform_0, window_bounds = array<i64: 64, 128>}, {pipeline_mode = #tpu.pipeline_mode<synchronous>, transform_indices = @transform_1, window_bounds = array<i64: 128, 128>}, {transform_indices = @transform_2, window_bounds = array<i64: 64, 128>}]} {
    %c0 = arith.constant 0 : index
    %c0_0 = arith.constant 0 : index
    %0 = vector.load %arg1[%c0, %c0_0] : memref<64x128xbf16, #tpu.memory_space<vmem>>, vector<64x128xbf16>
    %c0_1 = arith.constant 0 : index
    %c0_2 = arith.constant 0 : index
    %1 = vector.load %arg2[%c0_1, %c0_2] : memref<128x128xbf16, #tpu.memory_space<vmem>>, vector<128x128xbf16>
    %cst = arith.constant dense<0.000000e+00> : vector<64x128xf32>
    %2 = tpu.matmul %0, %1, %cst {dimension_numbers = #tpu.dot_dimension_numbers<[1], [0], [0], [1], [0, 0, 1, 1], [], []>} : vector<64x128xbf16>, vector<128x128xbf16>, vector<64x128xf32> -> vector<64x128xf32>
    %3 = arith.truncf %2 : vector<64x128xf32> to vector<64x128xbf16>
    %c0_3 = arith.constant 0 : index
    %c0_4 = arith.constant 0 : index
    %4 = vector.load %arg3[%c0_3, %c0_4] : memref<64x128xbf16, #tpu.memory_space<vmem>>, vector<64x128xbf16>
    tpu.vector_store %arg3[%c0_3, %c0_4], %3 {strides = array<i32>} : memref<64x128xbf16, #tpu.memory_space<vmem>>, vector<64x128xbf16>,
    return
  }
  func.func @transform_0(%arg0: i32) -> (i32, i32) {
    %c0_i32 = arith.constant 0 : i32
    %c0_i32_0 = arith.constant 0 : i32
    return %arg0, %c0_i32 : i32, i32
  }
  func.func @transform_1(%arg0: i32) -> (i32, i32) {
    %c0_i32 = arith.constant 0 : i32
    %c0_i32_0 = arith.constant 0 : i32
    %c0_i32_1 = arith.constant 0 : i32
    return %c0_i32, %c0_i32_0 : i32, i32
  }
  func.func @transform_2(%arg0: i32) -> (i32, i32) {
    %c0_i32 = arith.constant 0 : i32
    %c0_i32_0 = arith.constant 0 : i32
    return %arg0, %c0_i32 : i32, i32
  }
}

module attributes {stable_mosaic.version = 11 : i64} {
  func.func @_agg_proj_kernel(%arg0: i32, %arg1: i32, %arg2: memref<1x1xf32, #tpu.memory_space<smem>>, %arg3: memref<64x128xbf16, #tpu.memory_space<vmem>>, %arg4: memref<128x128xbf16, #tpu.memory_space<vmem>>, %arg5: memref<1x128xf32, #tpu.memory_space<vmem>>, %arg6: memref<128x128xf32, #tpu.memory_space<vmem>>, %arg7: memref<64x128xbf16, #tpu.memory_space<vmem>>, %arg8: memref<64x128xf32, #tpu.memory_space<vmem>>) attributes {dimension_semantics = [#tpu.dimension_semantics<parallel>, #tpu.dimension_semantics<arbitrary>], iteration_bounds = array<i64: 2, 1>, scalar_prefetch = 0 : i64, scratch_operands = 1 : i64, tpu.core_type = #tpu.core_type<tc>, window_params = [{transform_indices = @transform_0, window_bounds = array<i64: 1, 1>}, {transform_indices = @transform_1, window_bounds = array<i64: 64, 128>}, {pipeline_mode = #tpu.pipeline_mode<synchronous>, transform_indices = @transform_2, window_bounds = array<i64: 128, 128>}, {pipeline_mode = #tpu.pipeline_mode<synchronous>, transform_indices = @transform_3, window_bounds = array<i64: 1, 128>}, {pipeline_mode = #tpu.pipeline_mode<synchronous>, transform_indices = @transform_4, window_bounds = array<i64: 128, 128>}, {transform_indices = @transform_5, window_bounds = array<i64: 64, 128>}]} {
    %c0_i32 = arith.constant 0 : i32
    %0 = arith.cmpi eq, %arg1, %c0_i32 : i32
    %1 = arith.extui %0 : i1 to i32
    %c0_i32_0 = arith.constant 0 : i32
    %2 = arith.cmpi ne, %1, %c0_i32_0 : i32
    scf.if %2 {
      %cst_9 = arith.constant 0.000000e+00 : f32
      %15 = vector.broadcast %cst_9 : f32 to vector<64x128xf32>
      %c0_10 = arith.constant 0 : index
      %c0_11 = arith.constant 0 : index
      %16 = vector.load %arg8[%c0_10, %c0_11] : memref<64x128xf32, #tpu.memory_space<vmem>>, vector<64x128xf32>
      tpu.vector_store %arg8[%c0_10, %c0_11], %15 {strides = array<i32>} : memref<64x128xf32, #tpu.memory_space<vmem>>, vector<64x128xf32>,
    } else {
    }
    %c128_i32 = arith.constant 128 : i32
    %3 = arith.muli %arg1, %c128_i32 : i32
    %4 = tpu.assume_multiple %3, 128 : i32
    %5 = arith.index_cast %4 : i32 to index
    %c0 = arith.constant 0 : index
    %6 = vector.load %arg4[%5, %c0] : memref<128x128xbf16, #tpu.memory_space<vmem>>, vector<128x128xbf16>
    %c0_1 = arith.constant 0 : index
    %c0_2 = arith.constant 0 : index
    %7 = vector.load %arg8[%c0_1, %c0_2] : memref<64x128xf32, #tpu.memory_space<vmem>>, vector<64x128xf32>
    %c0_3 = arith.constant 0 : index
    %c0_4 = arith.constant 0 : index
    %8 = vector.load %arg3[%c0_3, %c0_4] : memref<64x128xbf16, #tpu.memory_space<vmem>>, vector<64x128xbf16>
    %cst = arith.constant dense<0.000000e+00> : vector<64x128xf32>
    %9 = tpu.matmul %8, %6, %cst {dimension_numbers = #tpu.dot_dimension_numbers<[1], [0], [0], [1], [0, 0, 1, 1], [], []>} : vector<64x128xbf16>, vector<128x128xbf16>, vector<64x128xf32> -> vector<64x128xf32>
    %10 = arith.addf %7, %9 : vector<64x128xf32>
    %c0_5 = arith.constant 0 : index
    %c0_6 = arith.constant 0 : index
    %11 = vector.load %arg8[%c0_5, %c0_6] : memref<64x128xf32, #tpu.memory_space<vmem>>, vector<64x128xf32>
    tpu.vector_store %arg8[%c0_5, %c0_6], %10 {strides = array<i32>} : memref<64x128xf32, #tpu.memory_space<vmem>>, vector<64x128xf32>,
    %c0_i32_7 = arith.constant 0 : i32
    %12 = arith.cmpi eq, %arg1, %c0_i32_7 : i32
    %13 = arith.extui %12 : i1 to i32
    %c0_i32_8 = arith.constant 0 : i32
    %14 = arith.cmpi ne, %13, %c0_i32_8 : i32
    scf.if %14 {
      %c0_9 = arith.constant 0 : index
      %c0_10 = arith.constant 0 : index
      %15 = memref.load %arg2[%c0_9, %c0_10] : memref<1x1xf32, #tpu.memory_space<smem>>
      %c0_11 = arith.constant 0 : index
      %c0_12 = arith.constant 0 : index
      %16 = vector.load %arg8[%c0_11, %c0_12] : memref<64x128xf32, #tpu.memory_space<vmem>>, vector<64x128xf32>
      %c0_13 = arith.constant 0 : index
      %c0_14 = arith.constant 0 : index
      %17 = vector.load %arg5[%c0_13, %c0_14] : memref<1x128xf32, #tpu.memory_space<vmem>>, vector<1x128xf32>
      %18 = vector.broadcast %17 : vector<1x128xf32> to vector<64x128xf32>
      %19 = arith.addf %16, %18 : vector<64x128xf32>
      %cst_15 = arith.constant 0.000000e+00 : f32
      %20 = vector.broadcast %cst_15 : f32 to vector<64x128xf32>
      %21 = arith.cmpf oge, %19, %20 : vector<64x128xf32>
      %22 = vector.broadcast %15 : f32 to vector<64x128xf32>
      %23 = arith.mulf %22, %19 : vector<64x128xf32>
      %24 = arith.select %21, %19, %23 : vector<64x128xi1>, vector<64x128xf32>
      %c0_16 = arith.constant 0 : index
      %c0_17 = arith.constant 0 : index
      %25 = vector.load %arg6[%c0_16, %c0_17] : memref<128x128xf32, #tpu.memory_space<vmem>>, vector<128x128xf32>
      %cst_18 = arith.constant dense<0.000000e+00> : vector<64x128xf32>
      %26 = tpu.matmul %24, %25, %cst_18 {dimension_numbers = #tpu.dot_dimension_numbers<[1], [0], [0], [1], [0, 0, 1, 1], [], []>} : vector<64x128xf32>, vector<128x128xf32>, vector<64x128xf32> -> vector<64x128xf32>
      %27 = arith.truncf %26 : vector<64x128xf32> to vector<64x128xbf16>
      %c0_19 = arith.constant 0 : index
      %c0_20 = arith.constant 0 : index
      %28 = vector.load %arg7[%c0_19, %c0_20] : memref<64x128xbf16, #tpu.memory_space<vmem>>, vector<64x128xbf16>
      tpu.vector_store %arg7[%c0_19, %c0_20], %27 {strides = array<i32>} : memref<64x128xbf16, #tpu.memory_space<vmem>>, vector<64x128xbf16>,
    } else {
    }
    return
  }
  func.func @transform_0(%arg0: i32, %arg1: i32) -> (i32, i32) {
    %c0_i32 = arith.constant 0 : i32
    %c0_i32_0 = arith.constant 0 : i32
    %c0_i32_1 = arith.constant 0 : i32
    return %c0_i32, %c0_i32_0 : i32, i32
  }
  func.func @transform_1(%arg0: i32, %arg1: i32) -> (i32, i32) {
    %c0_i32 = arith.constant 0 : i32
    return %arg0, %arg1 : i32, i32
  }
  func.func @transform_2(%arg0: i32, %arg1: i32) -> (i32, i32) {
    %c0_i32 = arith.constant 0 : i32
    %c0_i32_0 = arith.constant 0 : i32
    %c0_i32_1 = arith.constant 0 : i32
    return %c0_i32, %c0_i32_0 : i32, i32
  }
  func.func @transform_3(%arg0: i32, %arg1: i32) -> (i32, i32) {
    %c0_i32 = arith.constant 0 : i32
    %c0_i32_0 = arith.constant 0 : i32
    %c0_i32_1 = arith.constant 0 : i32
    return %c0_i32, %c0_i32_0 : i32, i32
  }
  func.func @transform_4(%arg0: i32, %arg1: i32) -> (i32, i32) {
    %c0_i32 = arith.constant 0 : i32
    %c0_i32_0 = arith.constant 0 : i32
    %c0_i32_1 = arith.constant 0 : i32
    return %c0_i32, %c0_i32_0 : i32, i32
  }
  func.func @transform_5(%arg0: i32, %arg1: i32) -> (i32, i32) {
    %c0_i32 = arith.constant 0 : i32
    %c0_i32_0 = arith.constant 0 : i32
    return %arg0, %c0_i32 : i32, i32
  }
}

module attributes {stable_mosaic.version = 11 : i64} {
  func.func @_agg_final_kernel(%arg0: i32, %arg1: i32, %arg2: memref<1x1xf32, #tpu.memory_space<smem>>, %arg3: memref<64x128xbf16, #tpu.memory_space<vmem>>, %arg4: memref<128x128xbf16, #tpu.memory_space<vmem>>, %arg5: memref<1x128xf32, #tpu.memory_space<vmem>>, %arg6: memref<64x128xf32, #tpu.memory_space<vmem>>, %arg7: memref<64x128xf32, #tpu.memory_space<vmem>>) attributes {dimension_semantics = [#tpu.dimension_semantics<parallel>, #tpu.dimension_semantics<arbitrary>], iteration_bounds = array<i64: 2, 1>, scalar_prefetch = 0 : i64, scratch_operands = 1 : i64, tpu.core_type = #tpu.core_type<tc>, window_params = [{transform_indices = @transform_0, window_bounds = array<i64: 1, 1>}, {transform_indices = @transform_1, window_bounds = array<i64: 64, 128>}, {pipeline_mode = #tpu.pipeline_mode<synchronous>, transform_indices = @transform_2, window_bounds = array<i64: 128, 128>}, {pipeline_mode = #tpu.pipeline_mode<synchronous>, transform_indices = @transform_3, window_bounds = array<i64: 1, 128>}, {transform_indices = @transform_4, window_bounds = array<i64: 64, 128>}]} {
    %c0_i32 = arith.constant 0 : i32
    %0 = arith.cmpi eq, %arg1, %c0_i32 : i32
    %1 = arith.extui %0 : i1 to i32
    %c0_i32_0 = arith.constant 0 : i32
    %2 = arith.cmpi ne, %1, %c0_i32_0 : i32
    scf.if %2 {
      %cst_9 = arith.constant 0.000000e+00 : f32
      %15 = vector.broadcast %cst_9 : f32 to vector<64x128xf32>
      %c0_10 = arith.constant 0 : index
      %c0_11 = arith.constant 0 : index
      %16 = vector.load %arg7[%c0_10, %c0_11] : memref<64x128xf32, #tpu.memory_space<vmem>>, vector<64x128xf32>
      tpu.vector_store %arg7[%c0_10, %c0_11], %15 {strides = array<i32>} : memref<64x128xf32, #tpu.memory_space<vmem>>, vector<64x128xf32>,
    } else {
    }
    %c128_i32 = arith.constant 128 : i32
    %3 = arith.muli %arg1, %c128_i32 : i32
    %4 = tpu.assume_multiple %3, 128 : i32
    %5 = arith.index_cast %4 : i32 to index
    %c0 = arith.constant 0 : index
    %6 = vector.load %arg4[%5, %c0] : memref<128x128xbf16, #tpu.memory_space<vmem>>, vector<128x128xbf16>
    %c0_1 = arith.constant 0 : index
    %c0_2 = arith.constant 0 : index
    %7 = vector.load %arg7[%c0_1, %c0_2] : memref<64x128xf32, #tpu.memory_space<vmem>>, vector<64x128xf32>
    %c0_3 = arith.constant 0 : index
    %c0_4 = arith.constant 0 : index
    %8 = vector.load %arg3[%c0_3, %c0_4] : memref<64x128xbf16, #tpu.memory_space<vmem>>, vector<64x128xbf16>
    %cst = arith.constant dense<0.000000e+00> : vector<64x128xf32>
    %9 = tpu.matmul %8, %6, %cst {dimension_numbers = #tpu.dot_dimension_numbers<[1], [0], [0], [1], [0, 0, 1, 1], [], []>} : vector<64x128xbf16>, vector<128x128xbf16>, vector<64x128xf32> -> vector<64x128xf32>
    %10 = arith.addf %7, %9 : vector<64x128xf32>
    %c0_5 = arith.constant 0 : index
    %c0_6 = arith.constant 0 : index
    %11 = vector.load %arg7[%c0_5, %c0_6] : memref<64x128xf32, #tpu.memory_space<vmem>>, vector<64x128xf32>
    tpu.vector_store %arg7[%c0_5, %c0_6], %10 {strides = array<i32>} : memref<64x128xf32, #tpu.memory_space<vmem>>, vector<64x128xf32>,
    %c0_i32_7 = arith.constant 0 : i32
    %12 = arith.cmpi eq, %arg1, %c0_i32_7 : i32
    %13 = arith.extui %12 : i1 to i32
    %c0_i32_8 = arith.constant 0 : i32
    %14 = arith.cmpi ne, %13, %c0_i32_8 : i32
    scf.if %14 {
      %c0_9 = arith.constant 0 : index
      %c0_10 = arith.constant 0 : index
      %15 = memref.load %arg2[%c0_9, %c0_10] : memref<1x1xf32, #tpu.memory_space<smem>>
      %c0_11 = arith.constant 0 : index
      %c0_12 = arith.constant 0 : index
      %16 = vector.load %arg7[%c0_11, %c0_12] : memref<64x128xf32, #tpu.memory_space<vmem>>, vector<64x128xf32>
      %c0_13 = arith.constant 0 : index
      %c0_14 = arith.constant 0 : index
      %17 = vector.load %arg5[%c0_13, %c0_14] : memref<1x128xf32, #tpu.memory_space<vmem>>, vector<1x128xf32>
      %18 = vector.broadcast %17 : vector<1x128xf32> to vector<64x128xf32>
      %19 = arith.addf %16, %18 : vector<64x128xf32>
      %cst_15 = arith.constant 0.000000e+00 : f32
      %20 = vector.broadcast %cst_15 : f32 to vector<64x128xf32>
      %21 = arith.cmpf oge, %19, %20 : vector<64x128xf32>
      %22 = vector.broadcast %15 : f32 to vector<64x128xf32>
      %23 = arith.mulf %22, %19 : vector<64x128xf32>
      %24 = arith.select %21, %19, %23 : vector<64x128xi1>, vector<64x128xf32>
      %c0_16 = arith.constant 0 : index
      %c0_17 = arith.constant 0 : index
      %25 = vector.load %arg6[%c0_16, %c0_17] : memref<64x128xf32, #tpu.memory_space<vmem>>, vector<64x128xf32>
      tpu.vector_store %arg6[%c0_16, %c0_17], %24 {strides = array<i32>} : memref<64x128xf32, #tpu.memory_space<vmem>>, vector<64x128xf32>,
    } else {
    }
    return
  }
  func.func @transform_0(%arg0: i32, %arg1: i32) -> (i32, i32) {
    %c0_i32 = arith.constant 0 : i32
    %c0_i32_0 = arith.constant 0 : i32
    %c0_i32_1 = arith.constant 0 : i32
    return %c0_i32, %c0_i32_0 : i32, i32
  }
  func.func @transform_1(%arg0: i32, %arg1: i32) -> (i32, i32) {
    %c0_i32 = arith.constant 0 : i32
    return %arg0, %arg1 : i32, i32
  }
  func.func @transform_2(%arg0: i32, %arg1: i32) -> (i32, i32) {
    %c0_i32 = arith.constant 0 : i32
    %c0_i32_0 = arith.constant 0 : i32
    %c0_i32_1 = arith.constant 0 : i32
    return %c0_i32, %c0_i32_0 : i32, i32
  }
  func.func @transform_3(%arg0: i32, %arg1: i32) -> (i32, i32) {
    %c0_i32 = arith.constant 0 : i32
    %c0_i32_0 = arith.constant 0 : i32
    %c0_i32_1 = arith.constant 0 : i32
    return %c0_i32, %c0_i32_0 : i32, i32
  }
  func.func @transform_4(%arg0: i32, %arg1: i32) -> (i32, i32) {
    %c0_i32 = arith.constant 0 : i32
    %c0_i32_0 = arith.constant 0 : i32
    return %arg0, %c0_i32 : i32, i32
  }
}

</mosaic_0001>

<bundles_post_ra>
// kernel: ppmi_gcn_forward.3
= control target key start
LH: loop header
LB: loop body
LE: loop exit
PB: predicated region body
PF: predicated region fallthrough
CT: control target
= control target key end

     0   :  { %s562_s9 = smov 0   ;;  %s616_s0 = inlined_call_operand.vmem [shape: bf16[128,128], index: 0, kind: input, shape index: {}]   ;;  %s617_s1 = inlined_call_operand.vmem [shape: bf16[128,128], index: 1, kind: input, shape index: {}]   ;;  %s618_s2 = inlined_call_operand.vmem [shape: bf16[128,128], index: 2, kind: output, shape index: {}]  }
   0x1 LB: > { %s405_s10 = sadd.s32 4294967295, %s545_s9   ;;  %p409_p0 = scmp.ge.s32.totalorder %s545_s9, 1  ;;  %s545_s9 = sphi %s562_s9, %s12_s9  }
   0x2   : > { %p113_p1 = scmp.lt.s32.totalorder %s545_s9, 3 }
   0x4   : > { %p114_p2 = pnand %p409_p0, %p113_p1 }
   0x5   : > { %s410_s13 = sshll.u32 (!%p114_p2), %s405_s10, 3 }
   0x6   : > { %117 = sbr.rel (%p114_p2) target bundleno = 246 (0xf6), region = 28  ;;  %p136_p3 = scmp.lt.s32.totalorder (!%p114_p2), %s410_s13, 15 }
   0xb   : > { %v527_v0 = vld [vmem:[%s617_s1 + $0x38] sm:$0xff]   ;;  %v528_v1 = vld [vmem:[%s617_s1 + $0x30] sm:$0xff]   ;;  %s620_s13 = smov (!%p136_p3, %s410_s13), 15  ;;  %v529_v2 = vld [vmem:[%s617_s1 + $0x28] sm:$0xff]  }
   0xc   : > { %479 = vmatprep.subr.bf16.mxu0 %v527_v0  ;;  %503 = vmatprep.subr.bf16.mxu1 %v527_v0  ;;  %s411_s18 = sshll.u32 %s620_s13, 2  ;;  %v530_v3 = vld [vmem:[%s617_s1 + $0x20] sm:$0xff]   ;;  %v531_v6 = vld [vmem:[%s617_s1 + $0x18] sm:$0xff]   ;;  %v532_v7 = vld [vmem:[%s617_s1 + $0x10] sm:$0xff]  }
   0xd   : > { %480 = vmatpush3.bf16.msra.mxu0 %v527_v0  ;;  %511 = vmatpush3.bf16.msra.mxu1 %v527_v0  ;;  %s587_s21 = scalar_lea.vmem %s616_s0, %s411_s18  ;;  %v533_v8 = vld [vmem:[%s617_s1 + $0x8] sm:$0xff]   ;;  %v534_v9 = vld [vmem:[%s617_s1] sm:$0xff]   ;;  %s145_s6 = scalar_lea.vmem %s618_s2, %s411_s18 }
   0xe   : > { %481 = vmatprep.subr.bf16.mxu0 %v528_v1  ;;  %504 = vmatprep.subr.bf16.mxu1 %v528_v1  ;;  %v535_v4 = vld [vmem:[%s587_s21] sm:$0xff]   ;;  %v536_v5 = vld [vmem:[%s587_s21 + $0x10] sm:$0xff]   ;;  %v537_v10 = vld [vmem:[%s587_s21 + $0x8] sm:$0xff]  }
   0xf   : > { %495 = vmatprep.mubr.bf16.mxu0 %v535_v4  ;;  %499 = vmatprep.mubr.bf16.mxu1 %v536_v5  ;;  %v538_v11 = vld [vmem:[%s587_s21 + $0x18] sm:$0xff]  }
  0x11   : > { %482 = vmatpush3.bf16.msra.mxu0 %v528_v1  ;;  %512 = vmatpush3.bf16.msra.mxu1 %v528_v1 }
  0x12   : > { %483 = vmatprep.subr.bf16.mxu0 %v529_v2  ;;  %505 = vmatprep.subr.bf16.mxu1 %v529_v2 }
  0x15   : > { %484 = vmatpush3.bf16.msra.mxu0 %v529_v2  ;;  %513 = vmatpush3.bf16.msra.mxu1 %v529_v2 }
  0x16   : > { %485 = vmatprep.subr.bf16.mxu0 %v530_v3  ;;  %506 = vmatprep.subr.bf16.mxu1 %v530_v3 }
  0x19   : > { %486 = vmatpush3.bf16.msra.mxu0 %v530_v3  ;;  %514 = vmatpush3.bf16.msra.mxu1 %v530_v3 }
  0x1a   : > { %487 = vmatprep.subr.bf16.mxu0 %v531_v6  ;;  %507 = vmatprep.subr.bf16.mxu1 %v531_v6 }
  0x1d   : > { %488 = vmatpush3.bf16.msra.mxu0 %v531_v6  ;;  %515 = vmatpush3.bf16.msra.mxu1 %v531_v6 }
  0x1e   : > { %489 = vmatprep.subr.bf16.mxu0 %v532_v7  ;;  %508 = vmatprep.subr.bf16.mxu1 %v532_v7 }
  0x21   : > { %490 = vmatpush3.bf16.msra.mxu0 %v532_v7  ;;  %516 = vmatpush3.bf16.msra.mxu1 %v532_v7 }
  0x22   : > { %491 = vmatprep.subr.bf16.mxu0 %v533_v8  ;;  %509 = vmatprep.subr.bf16.mxu1 %v533_v8 }
  0x25   : > { %492 = vmatpush3.bf16.msra.mxu0 %v533_v8  ;;  %517 = vmatpush3.bf16.msra.mxu1 %v533_v8 }
  0x26   : > { %493 = vmatprep.subr.bf16.mxu0 %v534_v9  ;;  %510 = vmatprep.subr.bf16.mxu1 %v534_v9 }
  0x29   : > { %494 = vmatpush3.bf16.msra.mxu0 %v534_v9  ;;  %518 = vmatpush3.bf16.msra.mxu1 %v534_v9 }
  0x2c   : > { %496 = vmatmul.mubr.bf16.vlgmr.msra.gmra.mxu0 %v537_v10  ;;  %500 = vmatmul.mubr.bf16.vlgmr.msra.gmra.mxu1 %v538_v11 }
  0xec   : > { %v497_v12 = vpop.f32.mrf.mxu0  ;;  %v501_v13 = vpop.f32.mrf.mxu1 }
  0xee   : > { %v278_v14 = vpop.f32.mrf.mxu0  ;;  %v294_v15 = vpop.f32.mrf.mxu1 }
  0xf0   : > { %v498_v16 = vpop.f32.mrf.mxu0  ;;  %v502_v17 = vpop.f32.mrf.mxu1 }
  0xf1   : > { %v452_v18 = vpack.c.bf16 %v498_v16, %v497_v12  ;;  %v462_v19 = vpack.c.bf16 %v502_v17, %v501_v13 }
  0xf2   : > { %v281_v20 = vpop.f32.mrf.mxu0  ;;  %v297_v21 = vpop.f32.mrf.mxu1 }
  0xf3   : > { %464 = vst [vmem:[%s145_s6 + $0x8] sm:$0xff] %v452_v18   ;;  %466 = vst [vmem:[%s145_s6 + $0x18] sm:$0xff] %v462_v19   ;;  %v447_v22 = vpack.c.bf16 %v281_v20, %v278_v14  ;;  %v457_v23 = vpack.c.bf16 %v297_v21, %v294_v15 }
  0xf5   : > { %448 = vst [vmem:[%s145_s6] sm:$0xff] %v447_v22   ;;  %465 = vst [vmem:[%s145_s6 + $0x10] sm:$0xff] %v457_v23  }
  0xf6 PF: > { %s12_s9 = sadd.s32 1, %s545_s9  }
  0xf7   : > { %p9_p4 = scmp.ge.s32.totalorder %s12_s9, 4  }
  0xf9   :  { %11 = sbr.rel (!%p9_p4) target bundleno = 1 (0x1), region = 58 }

// kernel: ppmi_gcn_forward.5
= control target key start
LH: loop header
LB: loop body
LE: loop exit
PB: predicated region body
PF: predicated region fallthrough
CT: control target
= control target key end

     0   :  { %s722_s17 = smov 0   ;;  %s724_s18 = smov 0   ;;  %s802_s0 = inlined_call_operand.<no memory space> [shape: f32[1,1], index: 0, kind: input, shape index: {}]   ;;  %s803_s1 = inlined_call_operand.vmem [shape: bf16[128,128], index: 1, kind: input, shape index: {}]   ;;  %s804_s2 = inlined_call_operand.vmem [shape: bf16[128,128], index: 2, kind: input, shape index: {}]   ;;  %s805_s3 = inlined_call_operand.vmem [shape: f32[1,128], index: 3, kind: input, shape index: {}]   ;;  %s806_s4 = inlined_call_operand.vmem [shape: f32[128,128], index: 4, kind: output, shape index: {}]  }
   0x1   :  { %9 = sst [smem:[#allocation3]] %s802_s0  ;;  %s726_s19 = smov 0  }
   0x2 LB: > { %s27_s0 = sadd.s32 1, %s688_s18  ;;  %p562_p0 = scmp.ge.s32.totalorder %s692_s19, 1  ;;  %s692_s19 = sphi %s726_s19, %s15_s19   ;;  %s688_s18 = sphi %s724_s18, %s808_s18   ;;  %s684_s17 = sphi %s722_s17, %s807_s17  }
   0x3   : > { %p29_p1 = scmp.ge.s32.totalorder %s27_s0, 2  ;;  %p181_p2 = scmp.lt.s32.totalorder %s692_s19, 3 }
   0x5   : > { %s810_s0 = smov (%p29_p1, %s27_s0), 0  ;;  %p182_p3 = pnand %p562_p0, %p181_p2 }
   0x6   : > { %s563_s22 = sshll.u32 (!%p182_p3), %s684_s17, 3  ;;  %s431_s15 = sld [smem:[#allocation3]] (!%p182_p3) }
   0x7   : > { %185 = sbr.rel (%p182_p3) target bundleno = 251 (0xfb), region = 36  ;;  %p211_p4 = scmp.lt.s32.totalorder (!%p182_p3), %s563_s22, 15 }
   0xc   : > { %v658_v0 = vld [vmem:[%s804_s2 + $0x38] sm:$0xff]   ;;  %v659_v1 = vld [vmem:[%s804_s2 + $0x30] sm:$0xff]   ;;  %s812_s22 = smov (!%p211_p4, %s563_s22), 15  ;;  %v660_v2 = vld [vmem:[%s804_s2 + $0x28] sm:$0xff]   ;;  %v463_v14 = vstv %s431_s15 }
   0xd   : > { %594 = vmatprep.subr.bf16.mxu0 %v658_v0  ;;  %618 = vmatprep.subr.bf16.mxu1 %v658_v0  ;;  %s564_s27 = sshll.u32 %s812_s22, 2  ;;  %v661_v3 = vld [vmem:[%s804_s2 + $0x20] sm:$0xff]   ;;  %v662_v6 = vld [vmem:[%s804_s2 + $0x18] sm:$0xff]   ;;  %v663_v7 = vld [vmem:[%s804_s2 + $0x10] sm:$0xff]   ;;  %s566_s20 = sshll.u32 %s812_s22, 3 }
   0xe   : > { %595 = vmatpush3.bf16.msra.mxu0 %v658_v0  ;;  %626 = vmatpush3.bf16.msra.mxu1 %v658_v0  ;;  %s755_s30 = scalar_lea.vmem %s803_s1, %s564_s27  ;;  %v664_v8 = vld [vmem:[%s804_s2 + $0x8] sm:$0xff]   ;;  %v665_v9 = vld [vmem:[%s804_s2] sm:$0xff]   ;;  %s783_s24 = scalar_lea.vmem %s806_s4, %s566_s20 }
   0xf   : > { %596 = vmatprep.subr.bf16.mxu0 %v659_v1  ;;  %619 = vmatprep.subr.bf16.mxu1 %v659_v1  ;;  %v666_v4 = vld [vmem:[%s755_s30] sm:$0xff]   ;;  %v667_v5 = vld [vmem:[%s755_s30 + $0x10] sm:$0xff]   ;;  %v668_v10 = vld [vmem:[%s755_s30 + $0x8] sm:$0xff]  }
  0x10   : > { %610 = vmatprep.mubr.bf16.mxu0 %v666_v4  ;;  %614 = vmatprep.mubr.bf16.mxu1 %v667_v5  ;;  %v669_v11 = vld [vmem:[%s755_s30 + $0x18] sm:$0xff]   ;;  %v579_v12 = vld [vmem:[%s805_s3] ss:$0 sm:$0xff] }
  0x12   : > { %597 = vmatpush3.bf16.msra.mxu0 %v659_v1  ;;  %627 = vmatpush3.bf16.msra.mxu1 %v659_v1 }
  0x13   : > { %598 = vmatprep.subr.bf16.mxu0 %v660_v2  ;;  %620 = vmatprep.subr.bf16.mxu1 %v660_v2 }
  0x16   : > { %599 = vmatpush3.bf16.msra.mxu0 %v660_v2  ;;  %628 = vmatpush3.bf16.msra.mxu1 %v660_v2 }
  0x17   : > { %600 = vmatprep.subr.bf16.mxu0 %v661_v3  ;;  %621 = vmatprep.subr.bf16.mxu1 %v661_v3 }
  0x1a   : > { %601 = vmatpush3.bf16.msra.mxu0 %v661_v3  ;;  %629 = vmatpush3.bf16.msra.mxu1 %v661_v3 }
  0x1b   : > { %602 = vmatprep.subr.bf16.mxu0 %v662_v6  ;;  %622 = vmatprep.subr.bf16.mxu1 %v662_v6 }
  0x1e   : > { %603 = vmatpush3.bf16.msra.mxu0 %v662_v6  ;;  %630 = vmatpush3.bf16.msra.mxu1 %v662_v6 }
  0x1f   : > { %604 = vmatprep.subr.bf16.mxu0 %v663_v7  ;;  %623 = vmatprep.subr.bf16.mxu1 %v663_v7 }
  0x22   : > { %605 = vmatpush3.bf16.msra.mxu0 %v663_v7  ;;  %631 = vmatpush3.bf16.msra.mxu1 %v663_v7 }
  0x23   : > { %606 = vmatprep.subr.bf16.mxu0 %v664_v8  ;;  %624 = vmatprep.subr.bf16.mxu1 %v664_v8 }
  0x26   : > { %607 = vmatpush3.bf16.msra.mxu0 %v664_v8  ;;  %632 = vmatpush3.bf16.msra.mxu1 %v664_v8 }
  0x27   : > { %608 = vmatprep.subr.bf16.mxu0 %v665_v9  ;;  %625 = vmatprep.subr.bf16.mxu1 %v665_v9 }
  0x2a   : > { %609 = vmatpush3.bf16.msra.mxu0 %v665_v9  ;;  %633 = vmatpush3.bf16.msra.mxu1 %v665_v9 }
  0x2d   : > { %611 = vmatmul.mubr.bf16.vlgmr.msra.gmra.mxu0 %v668_v10  ;;  %615 = vmatmul.mubr.bf16.vlgmr.msra.gmra.mxu1 %v669_v11 }
  0xed   : > { %v612_v13 = vpop.f32.mrf.mxu0  ;;  %v616_v15 = vpop.f32.mrf.mxu1 }
  0xee   : > { %v449_v16 = vadd.f32 %v612_v13, %v579_v12  ;;  %v453_v17 = vadd.f32 %v616_v15, %v579_v12 }
  0xef   : > { %v381_v18 = vpop.f32.mrf.mxu0  ;;  %v397_v19 = vpop.f32.mrf.mxu1 }
  0xf0   : > { %vm457_vm0 = vcmp.ge.f32.partialorder %v449_v16, 0.0  ;;  %v466_v20 = vmul.f32 %v463_v14, %v449_v16  ;;  %vm461_vm1 = vcmp.ge.f32.partialorder %v453_v17, 0.0  ;;  %v470_v21 = vmul.f32 %v463_v14, %v453_v17 }
  0xf1   : > { %v447_v22 = vadd.f32 %v579_v12, %v381_v18  ;;  %v451_v23 = vadd.f32 %v579_v12, %v397_v19  ;;  %v613_v24 = vpop.f32.mrf.mxu0  ;;  %v617_v25 = vpop.f32.mrf.mxu1 }
  0xf2   : > { %v474_v26 = vsel %vm457_vm0, %v449_v16, %v466_v20  ;;  %v478_v27 = vsel %vm461_vm1, %v453_v17, %v470_v21  ;;  %v450_v28 = vadd.f32 %v613_v24, %v579_v12  ;;  %v454_v29 = vadd.f32 %v617_v25, %v579_v12 }
  0xf3   : > { %482 = vst [vmem:[%s783_s24 + $0x10] sm:$0xff] %v474_v26  ;;  %486 = vst [vmem:[%s783_s24 + $0x30] sm:$0xff] %v478_v27  ;;  %vm455_vm2 = vcmp.ge.f32.partialorder %v447_v22, 0.0  ;;  %v464_v30 = vmul.f32 %v463_v14, %v447_v22  ;;  %vm459_vm3 = vcmp.ge.f32.partialorder %v451_v23, 0.0  ;;  %v468_v31 = vmul.f32 %v463_v14, %v451_v23  ;;  %v384_v32 = vpop.f32.mrf.mxu0  ;;  %v400_v33 = vpop.f32.mrf.mxu1 }
  0xf4   : > { %vm458_vm4 = vcmp.ge.f32.partialorder %v450_v28, 0.0  ;;  %v467_v34 = vmul.f32 %v463_v14, %v450_v28  ;;  %vm462_vm5 = vcmp.ge.f32.partialorder %v454_v29, 0.0  ;;  %v471_v35 = vmul.f32 %v463_v14, %v454_v29 }
  0xf5   : > { %v472_v36 = vsel %vm455_vm2, %v447_v22, %v464_v30  ;;  %v476_v37 = vsel %vm459_vm3, %v451_v23, %v468_v31  ;;  %v448_v38 = vadd.f32 %v579_v12, %v384_v32  ;;  %v452_v39 = vadd.f32 %v579_v12, %v400_v33 }
  0xf6   : > { %480 = vst [vmem:[%s783_s24] sm:$0xff] %v472_v36  ;;  %484 = vst [vmem:[%s783_s24 + $0x20] sm:$0xff] %v476_v37  ;;  %v475_v40 = vsel %vm458_vm4, %v450_v28, %v467_v34  ;;  %v479_v41 = vsel %vm462_vm5, %v454_v29, %v471_v35 }
  0xf7   : > { %483 = vst [vmem:[%s783_s24 + $0x18] sm:$0xff] %v475_v40  ;;  %487 = vst [vmem:[%s783_s24 + $0x38] sm:$0xff] %v479_v41  ;;  %vm456_vm6 = vcmp.ge.f32.partialorder %v448_v38, 0.0  ;;  %v465_v42 = vmul.f32 %v463_v14, %v448_v38  ;;  %vm460_vm7 = vcmp.ge.f32.partialorder %v452_v39, 0.0  ;;  %v469_v43 = vmul.f32 %v463_v14, %v452_v39 }
  0xf9   : > { %v473_v44 = vsel %vm456_vm6, %v448_v38, %v465_v42  ;;  %v477_v45 = vsel %vm460_vm7, %v452_v39, %v469_v43 }
  0xfa   : > { %481 = vst [vmem:[%s783_s24 + $0x8] sm:$0xff] %v473_v44  ;;  %485 = vst [vmem:[%s783_s24 + $0x28] sm:$0xff] %v477_v45 }
  0xfb PF: > { %s15_s19 = sadd.s32 1, %s692_s19   ;;  %s807_s17 = smov %s688_s18 }
  0xfc   : > { %p12_p5 = scmp.ge.s32.totalorder %s15_s19, 4   ;;  %s808_s18 = smov %s810_s0 }
  0xfe   :  { %14 = sbr.rel (!%p12_p5) target bundleno = 2 (0x2), region = 75 }

// kernel: ppmi_gcn_forward.4
= control target key start
LH: loop header
LB: loop body
LE: loop exit
PB: predicated region body
PF: predicated region fallthrough
CT: control target
= control target key end

     0   :  { %s998_s20 = smov 0   ;;  %s1000_s21 = smov 0   ;;  %s1119_s0 = inlined_call_operand.<no memory space> [shape: f32[1,1], index: 0, kind: input, shape index: {}]   ;;  %s1120_s1 = inlined_call_operand.vmem [shape: bf16[128,128], index: 1, kind: input, shape index: {}]   ;;  %s1121_s2 = inlined_call_operand.vmem [shape: bf16[128,128], index: 2, kind: input, shape index: {}]   ;;  %s1122_s3 = inlined_call_operand.vmem [shape: f32[1,128], index: 3, kind: input, shape index: {}]   ;;  %s1123_s4 = inlined_call_operand.vmem [shape: f32[128,128], index: 4, kind: input, shape index: {}]   ;;  %s1124_s5 = inlined_call_operand.vmem [shape: bf16[128,128], index: 5, kind: output, shape index: {}]  }
   0x1   :  { %10 = sst [smem:[#allocation3]] %s1119_s0  ;;  %s1002_s22 = smov 0  }
   0x2 LB: > { %s28_s0 = sadd.s32 1, %s959_s21  ;;  %p742_p0 = scmp.ge.s32.totalorder %s963_s22, 1  ;;  %s963_s22 = sphi %s1002_s22, %s16_s22   ;;  %s959_s21 = sphi %s1000_s21, %s1126_s21   ;;  %s955_s20 = sphi %s998_s20, %s1125_s20  }
   0x3   : > { %p30_p1 = scmp.ge.s32.totalorder %s28_s0, 2  ;;  %p206_p2 = scmp.lt.s32.totalorder %s963_s22, 3 }
   0x5   : > { %s1128_s0 = smov (%p30_p1, %s28_s0), 0  ;;  %p207_p3 = pnand %p742_p0, %p206_p2 }
   0x6   : > { %s743_s25 = sshll.u32 (!%p207_p3), %s955_s20, 3  ;;  %s458_s10 = sld [smem:[#allocation3]] (!%p207_p3) }
   0x7   : > { %210 = sbr.rel (%p207_p3) target bundleno = 459 (0x1cb), region = 40  ;;  %p238_p4 = scmp.lt.s32.totalorder (!%p207_p3), %s743_s25, 15 }
   0xc   : > { %v929_v0 = vld [vmem:[%s1121_s2 + $0x38] sm:$0xff]   ;;  %v930_v1 = vld [vmem:[%s1121_s2 + $0x30] sm:$0xff]   ;;  %s1130_s25 = smov (!%p238_p4, %s743_s25), 15  ;;  %v931_v2 = vld [vmem:[%s1121_s2 + $0x28] sm:$0xff]   ;;  %v490_v33 = vstv %s458_s10 }
   0xd   : > { %837 = vmatprep.subr.bf16.mxu0 %v929_v0  ;;  %s744_s30 = sshll.u32 %s1130_s25, 2  ;;  %v932_v3 = vld [vmem:[%s1121_s2 + $0x20] sm:$0xff]   ;;  %v933_v5 = vld [vmem:[%s1121_s2 + $0x18] sm:$0xff]   ;;  %v521_v7 = vld [vmem:[%s1123_s4 + $0x70] sm:$0xff] }
   0xe   : > { %838 = vmatpush3.bf16.msra.mxu0 %v929_v0  ;;  %s1033_s8 = scalar_lea.vmem %s1120_s1, %s744_s30  ;;  %v522_v6 = vld [vmem:[%s1123_s4 + $0x78] sm:$0xff]  ;;  %v520_v8 = vld [vmem:[%s1123_s4 + $0x68] sm:$0xff]  ;;  %v934_v9 = vld [vmem:[%s1121_s2 + $0x10] sm:$0xff]   ;;  %s250_s15 = scalar_lea.vmem %s1124_s5, %s744_s30 }
   0xf   : > { %839 = vmatprep.subr.bf16.mxu0 %v930_v1  ;;  %v937_v4 = vld [vmem:[%s1033_s8] sm:$0xff]   ;;  %861 = vmatprep.subr.mxu1 %v522_v6  ;;  %v518_v11 = vld [vmem:[%s1123_s4 + $0x58] sm:$0xff]  ;;  %v935_v12 = vld [vmem:[%s1121_s2 + $0x8] sm:$0xff]  }
  0x10   : > { %853 = vmatprep.mubr.bf16.mxu0 %v937_v4  ;;  %862 = vmatpush3.msra.mxu1 %v522_v6  ;;  %v519_v10 = vld [vmem:[%s1123_s4 + $0x60] sm:$0xff]  ;;  %v517_v13 = vld [vmem:[%s1123_s4 + $0x50] sm:$0xff]  ;;  %v516_v14 = vld [vmem:[%s1123_s4 + $0x48] sm:$0xff] }
  0x11   : > { %863 = vmatprep.subr.mxu1 %v521_v7  ;;  %v936_v15 = vld [vmem:[%s1121_s2] sm:$0xff]   ;;  %v514_v17 = vld [vmem:[%s1123_s4 + $0x38] sm:$0xff]  ;;  %v513_v18 = vld [vmem:[%s1123_s4 + $0x30] sm:$0xff] }
  0x12   : > { %840 = vmatpush3.bf16.msra.mxu0 %v930_v1  ;;  %864 = vmatpush3.msra.mxu1 %v521_v7  ;;  %v515_v16 = vld [vmem:[%s1123_s4 + $0x40] sm:$0xff]  ;;  %v938_v19 = vld [vmem:[%s1033_s8 + $0x8] sm:$0xff]   ;;  %v939_v20 = vld [vmem:[%s1033_s8 + $0x10] sm:$0xff]  }
  0x13   : > { %841 = vmatprep.subr.bf16.mxu0 %v931_v2  ;;  %865 = vmatprep.subr.mxu1 %v520_v8  ;;  %v940_v21 = vld [vmem:[%s1033_s8 + $0x18] sm:$0xff]   ;;  %v512_v22 = vld [vmem:[%s1123_s4 + $0x28] sm:$0xff]  ;;  %v511_v23 = vld [vmem:[%s1123_s4 + $0x20] sm:$0xff] }
  0x14   : > { %866 = vmatpush3.msra.mxu1 %v520_v8  ;;  %v510_v24 = vld [vmem:[%s1123_s4 + $0x18] sm:$0xff]  ;;  %v509_v25 = vld [vmem:[%s1123_s4 + $0x10] sm:$0xff]  ;;  %v508_v26 = vld [vmem:[%s1123_s4 + $0x8] sm:$0xff] }
  0x15   : > { %867 = vmatprep.subr.mxu1 %v519_v10  ;;  %v507_v27 = vld [vmem:[%s1123_s4] sm:$0xff] }
  0x16   : > { %842 = vmatpush3.bf16.msra.mxu0 %v931_v2  ;;  %868 = vmatpush3.msra.mxu1 %v519_v10  ;;  %v759_v29 = vld [vmem:[%s1122_s3] ss:$0 sm:$0xff] }
  0x17   : > { %843 = vmatprep.subr.bf16.mxu0 %v932_v3  ;;  %869 = vmatprep.subr.mxu1 %v518_v11 }
  0x18   : > { %870 = vmatpush3.msra.mxu1 %v518_v11 }
  0x19   : > { %871 = vmatprep.subr.mxu1 %v517_v13 }
  0x1a   : > { %844 = vmatpush3.bf16.msra.mxu0 %v932_v3  ;;  %872 = vmatpush3.msra.mxu1 %v517_v13 }
  0x1b   : > { %845 = vmatprep.subr.bf16.mxu0 %v933_v5  ;;  %873 = vmatprep.subr.mxu1 %v516_v14 }
  0x1c   : > { %874 = vmatpush3.msra.mxu1 %v516_v14 }
  0x1d   : > { %875 = vmatprep.subr.mxu1 %v515_v16 }
  0x1e   : > { %846 = vmatpush3.bf16.msra.mxu0 %v933_v5  ;;  %876 = vmatpush3.msra.mxu1 %v515_v16 }
  0x1f   : > { %847 = vmatprep.subr.bf16.mxu0 %v934_v9  ;;  %877 = vmatprep.subr.mxu1 %v514_v17 }
  0x20   : > { %878 = vmatpush3.msra.mxu1 %v514_v17 }
  0x21   : > { %879 = vmatprep.subr.mxu1 %v513_v18 }
  0x22   : > { %848 = vmatpush3.bf16.msra.mxu0 %v934_v9  ;;  %880 = vmatpush3.msra.mxu1 %v513_v18 }
  0x23   : > { %849 = vmatprep.subr.bf16.mxu0 %v935_v12  ;;  %881 = vmatprep.subr.mxu1 %v512_v22 }
  0x24   : > { %882 = vmatpush3.msra.mxu1 %v512_v22 }
  0x25   : > { %883 = vmatprep.subr.mxu1 %v511_v23 }
  0x26   : > { %850 = vmatpush3.bf16.msra.mxu0 %v935_v12  ;;  %884 = vmatpush3.msra.mxu1 %v511_v23 }
  0x27   : > { %851 = vmatprep.subr.bf16.mxu0 %v936_v15  ;;  %885 = vmatprep.subr.mxu1 %v510_v24 }
  0x28   : > { %886 = vmatpush3.msra.mxu1 %v510_v24 }
  0x29   : > { %887 = vmatprep.subr.mxu1 %v509_v25 }
  0x2a   : > { %852 = vmatpush3.bf16.msra.mxu0 %v936_v15  ;;  %888 = vmatpush3.msra.mxu1 %v509_v25 }
  0x2b   : > { %889 = vmatprep.subr.mxu1 %v508_v26 }
  0x2c   : > { %890 = vmatpush3.msra.mxu1 %v508_v26 }
  0x2d   : > { %854 = vmatmul.mubr.bf16.vlgmr.msra.gmra.mxu0 %v938_v19  ;;  %891 = vmatprep.subr.mxu1 %v507_v27 }
  0x2e   : > { %857 = vmatprep.mubr.bf16.mxu0 %v939_v20  ;;  %892 = vmatpush3.msra.mxu1 %v507_v27 }
  0x35   : > { %858 = vmatmul.mubr.bf16.gmra.mxu0 %v940_v21 }
  0xed   : > { %v855_v28 = vpop.f32.mrf.mxu0 }
  0xee   : > { %v476_v32 = vadd.f32 %v855_v28, %v759_v29 }
  0xef   : > { %v408_v30 = vpop.f32.mrf.mxu0 }
  0xf0   : > { %v474_v31 = vadd.f32 %v759_v29, %v408_v30  ;;  %v493_v40 = vmul.f32 %v490_v33, %v476_v32  ;;  %vm484_vm2 = vcmp.ge.f32.partialorder %v476_v32, 0.0 }
  0xf1   : > { %v856_v34 = vpop.f32.mrf.mxu0 }
  0xf2   : > { %vm482_vm0 = vcmp.ge.f32.partialorder %v474_v31, 0.0  ;;  %v491_v35 = vmul.f32 %v490_v33, %v474_v31  ;;  %v477_v37 = vadd.f32 %v856_v34, %v759_v29  ;;  %v501_v49 = vsel %vm484_vm2, %v476_v32, %v493_v40 }
  0xf3   : > { %v411_v36 = vpop.f32.mrf.mxu0 }
  0xf4   : > { %v475_v38 = vadd.f32 %v759_v29, %v411_v36  ;;  %v499_v39 = vsel %vm482_vm0, %v474_v31, %v491_v35  ;;  %v494_v44 = vmul.f32 %v490_v33, %v477_v37  ;;  %vm485_vm3 = vcmp.ge.f32.partialorder %v477_v37, 0.0 }
  0xf5   : > { %v859_v41 = vpop.f32.mrf.mxu0  ;;  %893 = vmatprep.mubr.f32.mxu1 %v499_v39 }
  0xf6   : > { %v492_v42 = vmul.f32 %v490_v33, %v475_v38  ;;  %vm483_vm1 = vcmp.ge.f32.partialorder %v475_v38, 0.0  ;;  %v480_v47 = vadd.f32 %v859_v41, %v759_v29  ;;  %v502_v54 = vsel %vm485_vm3, %v477_v37, %v494_v44 }
  0xf7   : > { %v424_v43 = vpop.f32.mrf.mxu0 }
  0xf8   : > { %v478_v45 = vadd.f32 %v759_v29, %v424_v43  ;;  %v500_v46 = vsel %vm483_vm1, %v475_v38, %v492_v42  ;;  %v497_v56 = vmul.f32 %v490_v33, %v480_v47  ;;  %vm488_vm6 = vcmp.ge.f32.partialorder %v480_v47, 0.0 }
  0xf9   : > { %v860_v48 = vpop.f32.mrf.mxu0  ;;  %894 = vmatmul.mubr.f32.vlgmr.msra.gmra.mxu1 %v500_v46 }
  0xfa   : > { %v495_v50 = vmul.f32 %v490_v33, %v478_v45  ;;  %896 = vmatprep.mubr.f32.mxu1 %v501_v49  ;;  %vm486_vm4 = vcmp.ge.f32.partialorder %v478_v45, 0.0  ;;  %v481_v52 = vadd.f32 %v860_v48, %v759_v29  ;;  %v505_v60 = vsel %vm488_vm6, %v480_v47, %v497_v56 }
  0xfb   : > { %v427_v51 = vpop.f32.mrf.mxu0 }
  0xfc   : > { %v479_v53 = vadd.f32 %v759_v29, %v427_v51  ;;  %v503_v55 = vsel %vm486_vm4, %v478_v45, %v495_v50  ;;  %v498_v58 = vmul.f32 %v490_v33, %v481_v52  ;;  %vm489_vm7 = vcmp.ge.f32.partialorder %v481_v52, 0.0 }
  0xfd   : > { %897 = vmatmul.mubr.f32.gmra.mxu1 %v502_v54 }
  0xfe   : > { %v496_v57 = vmul.f32 %v490_v33, %v479_v53  ;;  %899 = vmatprep.mubr.f32.mxu1 %v503_v55  ;;  %vm487_vm5 = vcmp.ge.f32.partialorder %v479_v53, 0.0  ;;  %v506_v61 = vsel %vm489_vm7, %v481_v52, %v498_v58 }
 0x100   : > { %v504_v59 = vsel %vm487_vm5, %v479_v53, %v496_v57 }
 0x101   : > { %900 = vmatmul.mubr.f32.gmra.mxu1 %v504_v59 }
 0x102   : > { %902 = vmatprep.mubr.f32.mxu1 %v505_v60 }
 0x105   : > { %903 = vmatmul.mubr.f32.gmra.mxu1 %v506_v61 }
 0x1b9   : > { %v895_v62 = vpop.f32.mrf.mxu1 }
 0x1bb   : > { %v589_v63 = vpop.f32.mrf.mxu1 }
 0x1bc   : > { %v781_v0 = vpack.c.bf16 %v895_v62, %v589_v63 }
 0x1bd   : > { %v898_v1 = vpop.f32.mrf.mxu1 }
 0x1be   : > { %782 = vst [vmem:[%s250_s15] sm:$0xff] %v781_v0  }
 0x1bf   : > { %v599_v2 = vpop.f32.mrf.mxu1 }
 0x1c0   : > { %v786_v3 = vpack.c.bf16 %v898_v1, %v599_v2 }
 0x1c1   : > { %v901_v4 = vpop.f32.mrf.mxu1 }
 0x1c2   : > { %798 = vst [vmem:[%s250_s15 + $0x8] sm:$0xff] %v786_v3  }
 0x1c3   : > { %v609_v5 = vpop.f32.mrf.mxu1 }
 0x1c4   : > { %v791_v6 = vpack.c.bf16 %v901_v4, %v609_v5 }
 0x1c5   : > { %v904_v7 = vpop.f32.mrf.mxu1 }
 0x1c6   : > { %799 = vst [vmem:[%s250_s15 + $0x10] sm:$0xff] %v791_v6  }
 0x1c7   : > { %v619_v8 = vpop.f32.mrf.mxu1 }
 0x1c8   : > { %v796_v9 = vpack.c.bf16 %v904_v7, %v619_v8 }
 0x1ca   : > { %800 = vst [vmem:[%s250_s15 + $0x18] sm:$0xff] %v796_v9  }
 0x1cb PF: > { %s16_s22 = sadd.s32 1, %s963_s22   ;;  %s1125_s20 = smov %s959_s21 }
 0x1cc   : > { %p13_p5 = scmp.ge.s32.totalorder %s16_s22, 4   ;;  %s1126_s21 = smov %s1128_s0 }
 0x1ce   :  { %15 = sbr.rel (!%p13_p5) target bundleno = 2 (0x2), region = 79 }

</bundles_post_ra>
